<compile_context>
chip_gen: v7x
topology: tpu7x:2x2x1
jax: 0.10.0
libtpu: 0.0.40
codegen_flags: <defaults>
</compile_context>

<pallas_src>
from functools import partial

import numpy as np
import jax
import jax.numpy as jnp
from jax.experimental import pallas as pl
from jax.experimental.pallas import tpu as pltpu


# ---------------------------------------------------------------------------
# Kernel: one fused MXU pass over [fc1 | fc2∘fc1], then bias + residual relu.
# ---------------------------------------------------------------------------
def mfc_kernel(x_ref, w_ref, b_ref, o_ref, *, hp, h):
    x = x_ref[...]                                           # (TB, D_in)
    # Single matmul, f32 accumulation; bias kept in f32.
    acc = jnp.dot(x, w_ref[...],
                  preferred_element_type=jnp.float32) + b_ref[...]  # (TB, 2*Hp)
    lin = acc[:, :h]             # fc1(x)               — lanes [0, h)
    res = acc[:, hp:hp + h]      # fc2(fc1(x)) branch   — starts on a vreg boundary
    # Inference-mode dropout is the identity.
    # TODO(synk): training-mode dropout (random mask) and the have_bn/BatchNorm
    # paths are omitted; the fc2-through-fc1 pre-fusion is inference-only.
    o_ref[...] = (lin + jnp.maximum(res, 0.0)).astype(o_ref.dtype)


# ---------------------------------------------------------------------------
# One-time parameter prep (pre-fusion, lane padding, optional MXU-dtype cast).
# ---------------------------------------------------------------------------
def mfc_prepare_params(w1, b1, w2, b2, *, mxu_dtype=None):
    """Pre-fuse fc2 through fc1 and pack weights for the kernel.

    Valid for the inference forward only (linear composition; dropout is the
    identity, no batchnorm).  Call once and reuse the returned params.
    """
    f32 = jnp.float32
    d_in, hidden = w1.shape

    w1_f = w1.astype(f32)
    w2_f = w2.astype(f32)
    w12 = w1_f @ w2_f                                   # (D_in, H)
    b12 = b1.astype(f32) @ w2_f + b2.astype(f32)        # (H,)

    # Pad each half to a multiple of 128 lanes so the in-kernel split of the
    # fused matmul result lands on vreg boundaries.
    hp = ((hidden + 127) // 128) * 128
    pad = hp - hidden
    w1_p = jnp.pad(w1_f, ((0, 0), (0, pad)))
    w12_p = jnp.pad(w12, ((0, 0), (0, pad)))
    b1_p = jnp.pad(b1.astype(f32).reshape(1, hidden), ((0, 0), (0, pad)))
    b12_p = jnp.pad(b12.reshape(1, hidden), ((0, 0), (0, pad)))

    w_cat = jnp.concatenate([w1_p, w12_p], axis=1)      # (D_in, 2*Hp)
    b_cat = jnp.concatenate([b1_p, b12_p], axis=1)      # (1, 2*Hp), stays f32

    if mxu_dtype is not None:
        w_cat = w_cat.astype(mxu_dtype)                 # MXU operands only

    return {
        "w_cat": w_cat,
        "b_cat": b_cat,
        "hidden": hidden,
        "hidden_pad": hp,
        "mxu_dtype": mxu_dtype,
    }


# ---------------------------------------------------------------------------
# Forward wrapper: ragged batch grid, lane-exact output, megacore-friendly tiles.
# ---------------------------------------------------------------------------
def mfc_forward(x, params, *, tile_b=None, out_dtype=None):
    """MFC inference forward for fc_layers=(D_in, H, H).

    x: (B, D_in).  Returns (B, H) in `out_dtype` (default: x.dtype).
    """
    w_cat = params["w_cat"]
    b_cat = params["b_cat"]
    hidden = params["hidden"]
    hp = params["hidden_pad"]
    mxu_dtype = params["mxu_dtype"]

    batch, d_in = x.shape
    out_dtype = out_dtype if out_dtype is not None else x.dtype

    if mxu_dtype is not None:
        x = x.astype(mxu_dtype)

    # Row granularity: 8 for 32-bit x, 16 for 16-bit (sublane packing).
    gran = 16 if jnp.dtype(x.dtype).itemsize < 4 else 8
    if tile_b is None:
        # >= 2 grid steps so v7x megacore has something to shard; cap at 1024
        # rows (out tile 1024x64 f32 = 256 KiB, x tile 128 KiB — VMEM is not
        # a constraint on any generation at these sizes).
        half = -(-batch // 2)
        tile_b = min(1024, -(-half // gran) * gran)
    tile_b = max(gran, (tile_b // gran) * gran)

    grid = (pl.cdiv(batch, tile_b),)        # ragged last block: reads ignored,
                                            # writes masked — no batch padding.
    kernel = partial(mfc_kernel, hp=hp, h=hidden)

    return pl.pallas_call(
        kernel,
        out_shape=jax.ShapeDtypeStruct((batch, hidden), out_dtype),
        grid=grid,
        in_specs=[
            pl.BlockSpec((tile_b, d_in), lambda i: (i, 0)),        # x tile
            pl.BlockSpec((d_in, 2 * hp), lambda i: (0, 0)),        # [W1 | W1@W2]
            pl.BlockSpec((1, 2 * hp), lambda i: (0, 0)),           # [b1 | b1@W2+b2]
        ],
        # True H-wide output: legal because the block last dim equals the full
        # array last dim; avoids the padded writeback + wrapper slice.
        out_specs=pl.BlockSpec((tile_b, hidden), lambda i: (i, 0)),
        compiler_params=pltpu.CompilerParams(
            dimension_semantics=("parallel",),
        ),
    )(x, w_cat, b_cat)


# ---------------------------------------------------------------------------
# Deterministic parameter init (mirrors xavier_init_fc: uniform(-r, r), bias=0)
# ---------------------------------------------------------------------------
def xavier_linear(key, in_features, out_features, dtype=jnp.float32):
    r = np.sqrt(6.0) / np.sqrt(in_features + out_features)
    # PyTorch stores weight as (out, in); sample that shape then transpose.
    w = jax.random.uniform(
        key, (out_features, in_features), dtype=dtype, minval=-r, maxval=r
    )
    b = jnp.zeros((out_features,), dtype=dtype)
    return w.T, b   # (in, out) layout for the kernel


if __name__ == "__main__":
    # fc_layers = (32, 64, 64): fc1: 32->64, fc2: 64->64 (residual branch)
    D_IN, HID = 32, 64

    key = jax.random.PRNGKey(0)
    kx, k1, k2, kx2 = jax.random.split(key, 4)

    w1, b1 = xavier_linear(k1, D_IN, HID)
    w2, b2 = xavier_linear(k2, HID, HID)

    params_f32 = mfc_prepare_params(w1, b1, w2, b2)
    params_bf16 = mfc_prepare_params(w1, b1, w2, b2, mxu_dtype=jnp.bfloat16)

    def reference(xv):
        h = xv @ w1 + b1
        return h + jnp.maximum(h @ w2 + b2, 0.0)

    # --- small batch: 2 grid steps of 8 rows (exercises megacore split) -----
    x = jax.random.normal(kx, (16, D_IN), dtype=jnp.float32)
    out = jax.block_until_ready(mfc_forward(x, params_f32))
    np.testing.assert_allclose(np.asarray(out), np.asarray(reference(x)),
                               rtol=1e-4, atol=1e-5)

    # --- non-multiple batch: ragged grid, masked last block, no padding -----
    x2 = jax.random.normal(kx2, (1000, D_IN), dtype=jnp.float32)
    out2 = jax.block_until_ready(mfc_forward(x2, params_f32))
    ref2 = reference(x2)
    np.testing.assert_allclose(np.asarray(out2), np.asarray(ref2),
                               rtol=1e-4, atol=1e-5)

    # --- bf16 MXU operands (valid on v5e/v6e/v7x), f32 accum + elementwise ---
    out_bf = jax.block_until_ready(mfc_forward(x2, params_bf16))
    np.testing.assert_allclose(np.asarray(out_bf), np.asarray(ref2),
                               rtol=5e-2, atol=5e-2)

    print("KERNEL_OK")
</pallas_src>

<mosaic_0001>
module attributes {stable_mosaic.version = 11 : i64} {
  func.func @mfc_kernel(%arg0: i32, %arg1: memref<8x32xf32, #tpu.memory_space<vmem>>, %arg2: memref<32x256xf32, #tpu.memory_space<vmem>>, %arg3: memref<1x256xf32, #tpu.memory_space<vmem>>, %arg4: memref<8x64xf32, #tpu.memory_space<vmem>>) attributes {dimension_semantics = [#tpu.dimension_semantics<parallel>], iteration_bounds = array<i64: 2>, scalar_prefetch = 0 : i64, scratch_operands = 0 : i64, tpu.core_type = #tpu.core_type<tc>, window_params = [{transform_indices = @transform_0, window_bounds = array<i64: 8, 32>}, {pipeline_mode = #tpu.pipeline_mode<synchronous>, transform_indices = @transform_1, window_bounds = array<i64: 32, 256>}, {pipeline_mode = #tpu.pipeline_mode<synchronous>, transform_indices = @transform_2, window_bounds = array<i64: 1, 256>}, {transform_indices = @transform_3, window_bounds = array<i64: 8, 64>}]} {
    %c0 = arith.constant 0 : index
    %c0_0 = arith.constant 0 : index
    %0 = vector.load %arg1[%c0, %c0_0] : memref<8x32xf32, #tpu.memory_space<vmem>>, vector<8x32xf32>
    %c0_1 = arith.constant 0 : index
    %c0_2 = arith.constant 0 : index
    %1 = vector.load %arg2[%c0_1, %c0_2] : memref<32x256xf32, #tpu.memory_space<vmem>>, vector<32x256xf32>
    %cst = arith.constant dense<0.000000e+00> : vector<8x256xf32>
    %2 = tpu.matmul %0, %1, %cst {dimension_numbers = #tpu.dot_dimension_numbers<[1], [0], [0], [1], [0, 0, 1, 1], [], []>} : vector<8x32xf32>, vector<32x256xf32>, vector<8x256xf32> -> vector<8x256xf32>
    %c0_3 = arith.constant 0 : index
    %c0_4 = arith.constant 0 : index
    %3 = vector.load %arg3[%c0_3, %c0_4] : memref<1x256xf32, #tpu.memory_space<vmem>>, vector<1x256xf32>
    %4 = vector.broadcast %3 : vector<1x256xf32> to vector<8x256xf32>
    %5 = arith.addf %2, %4 : vector<8x256xf32>
    %6 = vector.extract_strided_slice %5 {offsets = [0, 0], sizes = [8, 64], strides = [1, 1]} : vector<8x256xf32> to vector<8x64xf32>
    %7 = vector.extract_strided_slice %5 {offsets = [0, 128], sizes = [8, 64], strides = [1, 1]} : vector<8x256xf32> to vector<8x64xf32>
    %cst_5 = arith.constant 0.000000e+00 : f32
    %8 = vector.broadcast %cst_5 : f32 to vector<8x64xf32>
    %9 = arith.maximumf %7, %8 : vector<8x64xf32>
    %10 = arith.addf %6, %9 : vector<8x64xf32>
    %c0_6 = arith.constant 0 : index
    %c0_7 = arith.constant 0 : index
    %11 = vector.load %arg4[%c0_6, %c0_7] : memref<8x64xf32, #tpu.memory_space<vmem>>, vector<8x64xf32>
    tpu.vector_store %arg4[%c0_6, %c0_7], %10 {strides = array<i32>} : memref<8x64xf32, #tpu.memory_space<vmem>>, vector<8x64xf32>,
    return
  }
  func.func @transform_0(%arg0: i32) -> (i32, i32) {
    %c0_i32 = arith.constant 0 : i32
    %c0_i32_0 = arith.constant 0 : i32
    return %arg0, %c0_i32 : i32, i32
  }
  func.func @transform_1(%arg0: i32) -> (i32, i32) {
    %c0_i32 = arith.constant 0 : i32
    %c0_i32_0 = arith.constant 0 : i32
    %c0_i32_1 = arith.constant 0 : i32
    return %c0_i32, %c0_i32_0 : i32, i32
  }
  func.func @transform_2(%arg0: i32) -> (i32, i32) {
    %c0_i32 = arith.constant 0 : i32
    %c0_i32_0 = arith.constant 0 : i32
    %c0_i32_1 = arith.constant 0 : i32
    return %c0_i32, %c0_i32_0 : i32, i32
  }
  func.func @transform_3(%arg0: i32) -> (i32, i32) {
    %c0_i32 = arith.constant 0 : i32
    %c0_i32_0 = arith.constant 0 : i32
    return %arg0, %c0_i32 : i32, i32
  }
}

</mosaic_0001>

<bundles_post_ra>
// kernel: tpu_custom_call.1
= control target key start
LH: loop header
LB: loop body
LE: loop exit
PB: predicated region body
PF: predicated region fallthrough
CT: control target
= control target key end

     0   :  { %8 = vsyncpa [#allocation3], 0  ;;  %s837_s0 = inlined_call_operand.hbm [shape: f32[16,32], index: 0, kind: input, shape index: {}]   ;;  %s838_s1 = inlined_call_operand.hbm [shape: f32[32,256], index: 1, kind: input, shape index: {}]   ;;  %s839_s2 = inlined_call_operand.vmem [shape: f32[1,256], index: 2, kind: input, shape index: {}]   ;;  %s840_s3 = inlined_call_operand.hbm [shape: f32[16,64], index: 3, kind: output, shape index: {}]  }
   0x1   :  { %10 = vsyncpa [#allocation3 + $0x1], 0 }
   0x2   :  { %11 = vsyncpa [#allocation6], 0 }
   0x3   :  { %12 = vsyncpa [#allocation4], 0 }
   0x4   :  { %14 = vsyncpa [#allocation4 + $0x1], 0  ;;  %s634_s12 = smov 0   ;;  %s636_s13 = smov 0  }
   0x5   :  { %s638_s14 = smov 0   ;;  %s640_s15 = smov 0  }
   0x6 LB: > { %s655_s16 = sadd.s32 4294967295, %s606_s15   ;;  %s395_s17 = sadd.s32 4294967294, %s606_s15   ;;  %s606_s15 = sphi %s640_s15, %s860_s15   ;;  %s602_s14 = sphi %s638_s14, %s859_s14   ;;  %s598_s13 = sphi %s636_s13, %s858_s13   ;;  %s594_s12 = sphi %s634_s12, %s857_s12  }
   0x7   : > { %p40_p0 = scmp.ne.s32.totalorder %s598_s13, %s594_s12  ;;  %p841_p1 = scmp.eq.s32.totalorder %s655_s16, 0 }
   0x8   : > { %p112_p3 = scmp.eq.s32.totalorder %s395_s17, 1  ;;  %p396_p5 = scmp.ge.s32.totalorder %s606_s15, 1 }
   0x9   : > { %p664_p4 = por %p841_p1, %p40_p0  ;;  %p119_p7 = scmp.lt.s32.totalorder %s606_s15, 3 }
   0xa   : > { %p669_p6 = por %p112_p3, %p40_p0  ;;  %s608_s21 = smov [#allocation5]  }
   0xb   : > { %s844_s18 = scalar_select %p664_p4, 1, 0 }
   0xc   : > { %s845_s19 = scalar_select %p669_p6, 1, 0 }
   0xd   : > { %p674_p8 = pnand %p396_p5, %p119_p7  ;;  %s131_s22 = sshll.u32 %s608_s21, 4  ;;  %s678_s22 = int_to_ptr.vmem [resolvable:$true] %s131_s22 }
   0xe   : > { %s690_s24 = sadd.s32 1, %s606_s15   ;;  %s27_s25 = sadd.s32 1, %s602_s14 }
   0xf   : > { %s846_s20 = scalar_select %p674_p8, 1, 0 }
  0x10   : > { %p426_p9 = pneg %p674_p8  ;;  %s24_s26 = ssub.s32 %s606_s15, %s690_s24 }
  0x11   : > { %s478_s29 = scalar_lea.hbm %s838_s1, 1024 }
  0x12   : > { %p685_p11 = pnand %p426_p9, %p841_p1  ;;  %p479_p12 = scmp.ne.s32.totalorder %s838_s1, %s478_s29 }
  0x13   : > { %p485_p5 = scmp.lt.u32.totalorder %s478_s29, %s838_s1 }
  0x14   : > { %p480_p13 = pneg %p685_p11 }
  0x16   : > { %p481_p0 = pnand %p480_p13, %p479_p12 }
  0x18   : > { %p482_p3 = pneg %p481_p0 }
  0x1a   : > { %p487_p7 = pnand %p485_p5, %p482_p3 }
  0x1c   : > { %490 = shalt.err (!%p487_p7)
}
  0x1d   : > { %s491_s7 = scalar_lea.vmem %s678_s22, 1024  ;;  %p499_p2 = scmp.lt.s32.totalorder %s678_s22, %s678_s22 }
  0x1e   : > { %p492_p9 = scmp.ne.s32.totalorder %s678_s22, %s491_s7  ;;  %p500_p6 = scmp.lt.s32.totalorder %s491_s7, %s491_s7 }
  0x20   : > { %p494_p10 = pnand %p492_p9, %p480_p13  ;;  %p501_p4 = por %p500_p6, %p499_p2 }
  0x22   : > { %p495_p1 = pneg %p494_p10 }
  0x24   : > { %p502_p8 = pnand %p501_p4, %p495_p1 }
  0x26   : > { %505 = shalt.err (!%p502_p8)
}
  0x27   : > { %s609_s8 = smov 256   ;;  %s610_s9 = smov 16  }
  0x28   : > { %429 = dma.hbm_to_vmem [thread:$0]  (!%p685_p11), %s838_s1, 1024, %s678_s22, [#allocation6], %s609_s8, %s609_s8, %s610_s9  }
  0x29   : > { %p25_p2 = scmp.eq.s32.totalorder %s24_s26, 0  ;;  %p34_p1 = scmp.ne.s32.totalorder %s602_s14, %s598_s13 }
  0x2a   : > { %p35_p4 = scmp.eq.s32.totalorder %s606_s15, 0  ;;  %p439_p6 = scmp.lt.s32.totalorder %s606_s15, 2 }
  0x2b   : > { %s721_s17 = scalar_select %p25_p2, %s602_s14, %s27_s25  }
  0x2c   : > { %p36_p8 = por %p35_p4, %p34_p1  ;;  %p848_p10 = scmp.eq.s32.totalorder %s655_s16, 1 }
  0x2d   : > { %s148_s27 = sand.u32 1, %s602_s14   ;;  %s400_s28 = sshll.u32 %s606_s15, 7 }
  0x2e   : > { %p725_p12 = por %p848_p10, %p34_p1  ;;  %s399_s29 = sshll.u32 %s148_s27, 3 }
  0x2f   : > { %s734_s4 = scalar_lea.hbm %s837_s0, %s400_s28  ;;  %s152_s22 = scalar_lea.vmem [#allocation2], %s399_s29 }
  0x30   : > { %s159_s25 = sshll.u32 %s152_s22, 4  ;;  %p736_p11 = pnand %p439_p6, %p36_p8  ;;  %s740_s25 = int_to_ptr.vmem [resolvable:$true] %s159_s25 }
  0x31   : > { %s149_s5 = scalar_lea.sflag [#allocation3], %s148_s27  ;;  %s506_s6 = scalar_lea.hbm %s734_s4, 128 }
  0x32   : > { %p507_p13 = scmp.ne.s32.totalorder %s734_s4, %s506_s6  ;;  %p508_p0 = pneg %p736_p11 }
  0x33   : > { %s511_s9 = scalar_lea.hbm %s837_s0, 256  ;;  %p512_p7 = scmp.lt.u32.totalorder %s734_s4, %s837_s0 }
  0x34   : > { %p509_p3 = pnand %p508_p0, %p507_p13  ;;  %p513_p9 = scmp.lt.u32.totalorder %s511_s9, %s506_s6 }
  0x35   : > { %p515_p1 = scmp.lt.u32.totalorder %s506_s6, %s734_s4 }
  0x36   : > { %p510_p5 = pneg %p509_p3  ;;  %p514_p2 = por %p513_p9, %p512_p7 }
  0x38   : > { %p516_p4 = por %p515_p1, %p514_p2 }
  0x3a   : > { %p517_p6 = pnand %p516_p4, %p510_p5 }
  0x3c   : > { %520 = shalt.err (!%p517_p6)
}
  0x3d   : > { %s521_s27 = scalar_lea.vmem %s740_s25, 128  ;;  %s611_s28 = smov [#allocation2]  }
  0x3e   : > { %p522_p8 = scmp.ne.s32.totalorder %s740_s25, %s521_s27  ;;  %s526_s29 = sshll.u32 %s611_s28, 4  ;;  %s527_s29 = int_to_ptr.vmem [resolvable:$false] %s526_s29 }
  0x3f   : > { %s528_s23 = scalar_lea.vmem %s527_s29, 256  ;;  %p529_p3 = scmp.lt.s32.totalorder %s740_s25, %s527_s29 }
  0x40   : > { %p524_p10 = pnand %p522_p8, %p508_p0  ;;  %p530_p7 = scmp.lt.s32.totalorder %s528_s23, %s521_s27 }
  0x42   : > { %p525_p13 = pneg %p524_p10  ;;  %p531_p9 = por %p530_p7, %p529_p3 }
  0x44   : > { %p532_p2 = pnand %p531_p9, %p525_p13 }
  0x46   : > { %535 = shalt.err (!%p532_p2)
}
  0x47   : > { %433 = dma.hbm_to_vmem [thread:$0]  (!%p736_p11), %s734_s4, 128, %s740_s25, %s149_s5  }
  0x48   : > { %p851_p5 = scmp.ne.s32.totalorder %s846_s20, 0 }
  0x49   : > { %s770_s30 = sand.u32 (!%p851_p5), 1, %s598_s13   ;;  %p852_p0 = scmp.ne.s32.totalorder (!%p851_p5), %s844_s18, 0 }
  0x4a   : > { %168 = sbr.rel (%p851_p5) target bundleno = 329 (0x149), region = 32  ;;  %s402_s22 = sshll.u32 (!%p851_p5), %s770_s30, 3 }
  0x4b   : > { %s171_s6 = scalar_lea.sflag (!%p851_p5), [#allocation3], %s770_s30  ;;  %s174_s7 = scalar_lea.vmem (!%p851_p5), [#allocation2], %s402_s22 }
  0x51   : > { %581 = dma.done.wait (%p852_p0), %s171_s6, 128  }
  0x52   : > { %583 = vsyncadd (%p852_p0), %s171_s6, 4294967168  ;;  %p853_p11 = scmp.eq.s32.totalorder %s655_s16, 0 }
  0x54   : > { %585 = dma.done.wait (%p853_p11), [#allocation6], 1024   ;;  %p854_p1 = pmov %p853_p11 }
  0x55   : > { %v612_v0 = vmov 0.0   ;;  %v203_v1 = vld [vmem:[#allocation5 + $0x8] sm:$0xff]  ;;  %v205_v2 = vld [vmem:[#allocation5 + $0x18] sm:$0xff]  ;;  %v202_v3 = vld [vmem:[#allocation5] sm:$0xff]  ;;  %vm222_vm0 = vcmask 261120   ;;  %v212_v14 = vlaneseq  ;;  %s407_s4 = sshll.u32 %s655_s16, 7 }
  0x56   : > { %587 = vsyncadd (%p854_p1), [#allocation6], 4294966272  ;;  %290 = vmatprep.mubr.f32.mxu0 %v612_v0  ;;  %v410_v4 = vpack.c.bf16 %v205_v2, %v203_v1  ;;  %v204_v5 = vld [vmem:[#allocation5 + $0x10] sm:$0xff]  ;;  %v207_v6 = vld [vmem:[#allocation5 + $0x28] sm:$0xff]  ;;  %s200_s25 = scalar_lea.vmem [#allocation7], %s402_s22  ;;  %vm299_vm1 = vcmask 523264   ;;  %s793_s9 = scalar_lea.hbm %s840_s3, %s407_s4 }
  0x57   : > { %v209_v7 = vld [vmem:[#allocation5 + $0x38] sm:$0xff]  ;;  %v412_v8 = vpack.c.bf16 %v204_v5, %v202_v3  ;;  %v206_v10 = vld [vmem:[#allocation5 + $0x20] sm:$0xff]  ;;  %v208_v11 = vld [vmem:[#allocation5 + $0x30] sm:$0xff]  ;;  %v213_v15 = vshrl.u32 %v212_v14, 7  ;;  %s315_s26 = sshll.u32 %s200_s25, 4  ;;  %s302_s10 = scalar_lea.sflag [#allocation4], %s770_s30  ;;  %s795_s26 = int_to_ptr.vmem [resolvable:$true] %s315_s26 }
  0x58   : > { %v414_v9 = vpack.c.bf16 %v209_v7, %v207_v6  ;;  %411 = vmatprep.subr.bf16.mxu0 %v410_v4  ;;  %v416_v12 = vpack.c.bf16 %v208_v11, %v206_v10  ;;  %v201_v13 = vld [vmem:[%s174_s7] sm:$0xff]  ;;  %s536_s16 = scalar_lea.vmem %s795_s26, 128  ;;  %s613_s11 = smov [#allocation7]  }
  0x59   : > { %413 = vmatpush1.bf16.msra.mxu0 %v412_v8  ;;  %v218_v16 = vsub.s32 1, %v213_v15  ;;  %v210_v17 = vld [vmem:[%s839_s2] sm:$0x3]  ;;  %v214_v18 = vsub.s32 0, %v213_v15  ;;  %p537_p4 = scmp.ne.s32.totalorder %s795_s26, %s536_s16  ;;  %s540_s27 = sshll.u32 %s613_s11, 4  ;;  %s541_s27 = int_to_ptr.vmem [resolvable:$false] %s540_s27 }
  0x5a   : > { %415 = vmatprep.subr.bf16.mxu0 %v414_v9  ;;  %s542_s28 = scalar_lea.vmem %s541_s27, 256  ;;  %p543_p10 = scmp.lt.s32.totalorder %s795_s26, %s541_s27 }
  0x5b   : > { %v219_v19 = vrot.slane %v210_v17, %v218_v16  ;;  %v215_v20 = vrot.slane %v210_v17, %v214_v18  ;;  %p538_p6 = pnand %p537_p4, %p725_p12  ;;  %p544_p13 = scmp.lt.s32.totalorder %s542_s28, %s536_s16 }
  0x5d   : > { %417 = vmatpush1.bf16.msra.mxu0 %v416_v12  ;;  %p539_p8 = pneg %p538_p6  ;;  %p545_p3 = por %p544_p13, %p543_p10 }
  0x5f   : > { %p546_p7 = pnand %p545_p3, %p539_p8 }
  0x60   : > { %405 = vmatmul.mubr.msk.f32.vlgmr.msra.gmra.mrb[0].mxu0 %vm222_vm0, %v201_v13 }
 0x133   : > { %v292_v21 = vpop.f32.mrb[0].mxu0 }
 0x134   : > { %v294_v22 = vpop.f32.mrb[1].mxu0  ;;  %v293_v24 = vadd.f32 %v292_v21, %v215_v20 }
 0x135   : > { %v295_v23 = vadd.f32 %v294_v22, %v219_v19 }
 0x137   : > { %v297_v25 = vmax.f32 %v295_v23, 0.0 }
 0x139   : > { %v298_v26 = vadd.f32 %v297_v25, %v293_v24 }
 0x13b   : > { %300 = vst.msk [vmem:[%s200_s25] sm:$0xff] %vm299_vm1, %v298_v26 }
 0x13c   : > { %549 = shalt.err (!%p546_p7)
}
 0x13d   : > { %s550_s29 = scalar_lea.hbm %s793_s9, 128  ;;  %s554_s22 = scalar_lea.hbm %s840_s3, 256 }
 0x13e   : > { %p551_p9 = scmp.ne.s32.totalorder %s793_s9, %s550_s29  ;;  %p555_p0 = scmp.lt.u32.totalorder %s793_s9, %s840_s3 }
 0x13f   : > { %p556_p11 = scmp.lt.u32.totalorder %s554_s22, %s550_s29  ;;  %p558_p4 = scmp.lt.u32.totalorder %s550_s29, %s793_s9 }
 0x140   : > { %p552_p2 = pnand %p551_p9, %p725_p12 }
 0x141   : > { %p557_p1 = por %p556_p11, %p555_p0 }
 0x142   : > { %p553_p5 = pneg %p552_p2 }
 0x143   : > { %p559_p6 = por %p558_p4, %p557_p1 }
 0x145   : > { %p560_p8 = pnand %p559_p6, %p553_p5 }
 0x147   : > { %563 = shalt.err (!%p560_p8)
}
 0x148   : > { %424 = dma.vmem_to_hbm [thread:$0]  (%p725_p12), %s795_s26, 128, %s793_s9, %s302_s10  }
 0x149 PF: > { %s327_s18 = sand.u32 1, %s594_s12   ;;  %p855_p10 = scmp.ne.s32.totalorder %s845_s19, 0 }
 0x14a   : > { %p856_p13 = scmp.ge.s32.totalorder %s606_s15, 2  ;;  %s328_s20 = scalar_lea.sflag [#allocation4], %s327_s18 }
 0x14c   : > { %p435_p3 = pnand %p856_p13, %p855_p10 }
 0x14e   : > { %589 = dma.done.wait (!%p435_p3), %s328_s20, 128  }
 0x14f   : > { %591 = vsyncadd (!%p435_p3), %s328_s20, 4294967168  ;;  %p17_p7 = scmp.ge.s32.totalorder %s690_s24, 4   ;;  %s857_s12 = smov %s598_s13 }
 0x150   : > { %s858_s13 = smov %s602_s14  ;;  %s859_s14 = smov %s721_s17 }
 0x151   : > { %s860_s15 = smov %s690_s24  ;;  %19 = sbr.rel (!%p17_p7) target bundleno = 6 (0x6), region = 81 }
 0x158   :  { %333 = vsyncpa [#allocation3], 1 }
 0x159   :  { %335 = vsyncpa [#allocation3 + $0x1], 1 }
 0x15a   :  { %336 = vsyncpa [#allocation6], 1 }
 0x15b   :  { %337 = vsyncpa [#allocation4], 1 }
 0x15c   :  { %339 = vsyncpa [#allocation4 + $0x1], 1 }

</bundles_post_ra>
